<compile_context>
chip_gen: v5e
topology: v5e:2x2
jax: 0.10.0
libtpu: 0.0.40
codegen_flags: <defaults>
</compile_context>

<pallas_src>
import jax
import jax.numpy as jnp
from jax.experimental import pallas as pl
from jax.experimental.pallas import tpu as pltpu


def _block1_kernel(x_ref, w_ref, b_ref, o_ref):
    # x_ref / o_ref: (N, C, tile_L) VMEM tiles (L = lane dim, kept dense).
    # w_ref: (C, C) 1x1-conv weight, pre-scaled by 2 (residual fold).
    # b_ref: (C, 1) bias, broadcast over L.
    w = w_ref[...].astype(jnp.float32)
    b = b_ref[...].astype(jnp.float32)

    def body(n, carry):
        # Plain 2D (C,C) @ (C,tile_L) matmul per batch row -> MXU, no transposes,
        # lane-dense (C, tile_L) store.
        y = jnp.dot(w, x_ref[n].astype(jnp.float32),
                    preferred_element_type=jnp.float32) + b
        o_ref[n] = jnp.maximum(y, 0.0).astype(o_ref.dtype)
        return carry

    # Short static trip-count -> unrolled in-kernel loop (no extra grid steps).
    jax.lax.fori_loop(0, x_ref.shape[0], body, 0, unroll=True)


def basic_block_1_forward(x, w_end, b_end, *, vmem_budget_bytes=16 << 20):
    """out = relu(Conv1d_1x1(2*x; w_end, b_end)).

    x: (N, C, L) f32; w_end: (C, C, 1); b_end: (C,) -> (N, C, L)
    """
    N, C, L = x.shape
    itemsize = jnp.dtype(x.dtype).itemsize

    # Fold the residual doubling (`out += identity`, out aliasing x) into the
    # O(C^2) weight (free) instead of an O(N*C*L) VPU multiply over the data.
    w2d = (w_end[:, :, 0] * 2.0).astype(x.dtype)   # (C, C)
    b2d = b_end.reshape(C, 1).astype(x.dtype)      # (C, 1)

    # Lane-dense L tiling, sized against VMEM: x-in + y-out, double-buffered.
    # At toy sizes tile_l == L -> a single grid step; at large L we tile in
    # >=512-lane chunks (85% of HBM roofline) and the grid axis is "parallel".
    bytes_per_col = 2 * 2 * N * C * itemsize
    max_cols = max(512, ((vmem_budget_bytes // bytes_per_col) // 512) * 512)
    tile_l = L if L <= max_cols else max_cols
    grid_l = pl.cdiv(L, tile_l)

    cost = pl.CostEstimate(
        flops=2 * N * C * C * L,
        transcendentals=0,
        bytes_accessed=2 * N * C * L * itemsize + C * C * itemsize + C * itemsize,
    )

    return pl.pallas_call(
        _block1_kernel,
        out_shape=jax.ShapeDtypeStruct((N, C, L), x.dtype),
        grid_spec=pltpu.PrefetchScalarGridSpec(
            num_scalar_prefetch=0,
            grid=(grid_l,),
            in_specs=[
                pl.BlockSpec((N, C, tile_l), lambda l: (0, 0, l)),
                # Constant index_map -> weight/bias held resident across steps.
                pl.BlockSpec((C, C), lambda l: (0, 0)),
                pl.BlockSpec((C, 1), lambda l: (0, 0)),
            ],
            out_specs=pl.BlockSpec((N, C, tile_l), lambda l: (0, 0, l)),
        ),
        compiler_params=pltpu.CompilerParams(
            dimension_semantics=("parallel",)),
        cost_estimate=cost,
    )(x, w2d, b2d)


if __name__ == "__main__":
    key = jax.random.PRNGKey(0)
    N, C, L = 2, 8, 128   # batch, channels, sequence length (Conv1d -> NCL)
    keys = jax.random.split(key, 12)
    x = jax.random.normal(keys[0], (N, C, L), jnp.float32)

    # Deterministic parameter init (PyTorch-style uniform bound 1/sqrt(fan_in)).
    def conv1d_params(k, c, ksize):
        kw, kb = jax.random.split(k)
        bound = 1.0 / float(jnp.sqrt(c * ksize))
        w = jax.random.uniform(kw, (c, c, ksize), jnp.float32, -bound, bound)
        b = jax.random.uniform(kb, (c,), jnp.float32, -bound, bound)
        return w, b

    # Inner BasicBlock_0 params (3 x {t: k3, s: k3, end: k1}) — shape fidelity
    # only; dead w.r.t. the output since BasicBlock_0.forward returns x.
    for i in range(3):
        conv1d_params(keys[1 + 3 * i + 0], C, 3)  # t conv (dead)
        conv1d_params(keys[1 + 3 * i + 1], C, 3)  # s conv (dead)
        conv1d_params(keys[1 + 3 * i + 2], C, 1)  # end conv (dead)

    # Outer BasicBlock_1.end 1x1 conv — the only live parameters.
    w_end, b_end = conv1d_params(keys[10], C, 1)

    out = basic_block_1_forward(x, w_end, b_end)
    out = jax.block_until_ready(out)

    # Pure-JAX reference for the traced semantics: relu(W_end @ (2x) + b_end).
    ref = jnp.maximum(
        jnp.einsum("oc,ncl->nol", w_end[:, :, 0], 2.0 * x) + b_end[None, :, None],
        0.0,
    )
    assert out.shape == (N, C, L)
    assert jnp.allclose(out, ref, atol=1e-5, rtol=1e-5), "mismatch vs reference"
    print("KERNEL_OK")
</pallas_src>

<mosaic_0001>
module attributes {stable_mosaic.version = 11 : i64} {
  func.func @_block1_kernel(%arg0: i32, %arg1: memref<2x8x128xf32, #tpu.memory_space<vmem>>, %arg2: memref<8x8xf32, #tpu.memory_space<vmem>>, %arg3: memref<8x1xf32, #tpu.memory_space<vmem>>, %arg4: memref<2x8x128xf32, #tpu.memory_space<vmem>>) attributes {dimension_semantics = [#tpu.dimension_semantics<parallel>], iteration_bounds = array<i64: 1>, scalar_prefetch = 0 : i64, scratch_operands = 0 : i64, tpu.core_type = #tpu.core_type<tc>, window_params = [{transform_indices = @transform_0, window_bounds = array<i64: 2, 8, 128>}, {pipeline_mode = #tpu.pipeline_mode<synchronous>, transform_indices = @transform_1, window_bounds = array<i64: 8, 8>}, {pipeline_mode = #tpu.pipeline_mode<synchronous>, transform_indices = @transform_2, window_bounds = array<i64: 8, 1>}, {transform_indices = @transform_3, window_bounds = array<i64: 2, 8, 128>}]} {
    %c0 = arith.constant 0 : index
    %c0_0 = arith.constant 0 : index
    %0 = vector.load %arg2[%c0, %c0_0] : memref<8x8xf32, #tpu.memory_space<vmem>>, vector<8x8xf32>
    %c0_1 = arith.constant 0 : index
    %c0_2 = arith.constant 0 : index
    %1 = vector.load %arg3[%c0_1, %c0_2] : memref<8x1xf32, #tpu.memory_space<vmem>>, vector<8x1xf32>
    %c0_i32 = arith.constant 0 : i32
    %2 = arith.index_cast %c0_i32 : i32 to index
    %c0_3 = arith.constant 0 : index
    %c0_4 = arith.constant 0 : index
    %3 = vector.load %arg1[%2, %c0_3, %c0_4] : memref<2x8x128xf32, #tpu.memory_space<vmem>>, vector<1x8x128xf32>
    %4 = vector.shape_cast %3 : vector<1x8x128xf32> to vector<8x128xf32>
    %cst = arith.constant dense<0.000000e+00> : vector<8x128xf32>
    %5 = tpu.matmul %0, %4, %cst {dimension_numbers = #tpu.dot_dimension_numbers<[1], [0], [0], [1], [0, 0, 1, 1], [], []>} : vector<8x8xf32>, vector<8x128xf32>, vector<8x128xf32> -> vector<8x128xf32>
    %6 = vector.broadcast %1 : vector<8x1xf32> to vector<8x128xf32>
    %7 = arith.addf %5, %6 : vector<8x128xf32>
    %cst_5 = arith.constant 0.000000e+00 : f32
    %8 = vector.broadcast %cst_5 : f32 to vector<8x128xf32>
    %9 = arith.maximumf %7, %8 : vector<8x128xf32>
    %10 = arith.index_cast %c0_i32 : i32 to index
    %c0_6 = arith.constant 0 : index
    %c0_7 = arith.constant 0 : index
    %11 = vector.load %arg4[%10, %c0_6, %c0_7] : memref<2x8x128xf32, #tpu.memory_space<vmem>>, vector<1x8x128xf32>
    %12 = vector.shape_cast %11 : vector<1x8x128xf32> to vector<8x128xf32>
    %13 = vector.shape_cast %9 : vector<8x128xf32> to vector<1x8x128xf32>
    tpu.vector_store %arg4[%10, %c0_6, %c0_7], %13 {strides = array<i32>} : memref<2x8x128xf32, #tpu.memory_space<vmem>>, vector<1x8x128xf32>,
    %c1_i32 = arith.constant 1 : i32
    %14 = arith.index_cast %c1_i32 : i32 to index
    %c0_8 = arith.constant 0 : index
    %c0_9 = arith.constant 0 : index
    %15 = vector.load %arg1[%14, %c0_8, %c0_9] : memref<2x8x128xf32, #tpu.memory_space<vmem>>, vector<1x8x128xf32>
    %16 = vector.shape_cast %15 : vector<1x8x128xf32> to vector<8x128xf32>
    %cst_10 = arith.constant dense<0.000000e+00> : vector<8x128xf32>
    %17 = tpu.matmul %0, %16, %cst_10 {dimension_numbers = #tpu.dot_dimension_numbers<[1], [0], [0], [1], [0, 0, 1, 1], [], []>} : vector<8x8xf32>, vector<8x128xf32>, vector<8x128xf32> -> vector<8x128xf32>
    %18 = vector.broadcast %1 : vector<8x1xf32> to vector<8x128xf32>
    %19 = arith.addf %17, %18 : vector<8x128xf32>
    %cst_11 = arith.constant 0.000000e+00 : f32
    %20 = vector.broadcast %cst_11 : f32 to vector<8x128xf32>
    %21 = arith.maximumf %19, %20 : vector<8x128xf32>
    %22 = arith.index_cast %c1_i32 : i32 to index
    %c0_12 = arith.constant 0 : index
    %c0_13 = arith.constant 0 : index
    %23 = vector.load %arg4[%22, %c0_12, %c0_13] : memref<2x8x128xf32, #tpu.memory_space<vmem>>, vector<1x8x128xf32>
    %24 = vector.shape_cast %23 : vector<1x8x128xf32> to vector<8x128xf32>
    %25 = vector.shape_cast %21 : vector<8x128xf32> to vector<1x8x128xf32>
    tpu.vector_store %arg4[%22, %c0_12, %c0_13], %25 {strides = array<i32>} : memref<2x8x128xf32, #tpu.memory_space<vmem>>, vector<1x8x128xf32>,
    %c2_i32 = arith.constant 2 : i32
    return
  }
  func.func @transform_0(%arg0: i32) -> (i32, i32, i32) {
    %c0_i32 = arith.constant 0 : i32
    %c0_i32_0 = arith.constant 0 : i32
    %c0_i32_1 = arith.constant 0 : i32
    return %c0_i32, %c0_i32_0, %arg0 : i32, i32, i32
  }
  func.func @transform_1(%arg0: i32) -> (i32, i32) {
    %c0_i32 = arith.constant 0 : i32
    %c0_i32_0 = arith.constant 0 : i32
    %c0_i32_1 = arith.constant 0 : i32
    return %c0_i32, %c0_i32_0 : i32, i32
  }
  func.func @transform_2(%arg0: i32) -> (i32, i32) {
    %c0_i32 = arith.constant 0 : i32
    %c0_i32_0 = arith.constant 0 : i32
    %c0_i32_1 = arith.constant 0 : i32
    return %c0_i32, %c0_i32_0 : i32, i32
  }
  func.func @transform_3(%arg0: i32) -> (i32, i32, i32) {
    %c0_i32 = arith.constant 0 : i32
    %c0_i32_0 = arith.constant 0 : i32
    %c0_i32_1 = arith.constant 0 : i32
    return %c0_i32, %c0_i32_0, %arg0 : i32, i32, i32
  }
}

</mosaic_0001>

<bundles_post_ra>
// kernel: tpu_custom_call.1
= control target key start
LH: loop header
LB: loop body
LE: loop exit
PB: predicated region body
PF: predicated region fallthrough
CT: control target
= control target key end

     0   :  { %8 = vsyncpa [#allocation3], 0  ;;  %s212_s0 = inlined_call_operand.hbm [shape: f32[2,8,128], index: 0, kind: input, shape index: {}]   ;;  %s213_s1 = inlined_call_operand.vmem [shape: f32[8,8], index: 1, kind: input, shape index: {}]   ;;  %s214_s2 = inlined_call_operand.vmem [shape: f32[8,1], index: 2, kind: input, shape index: {}]   ;;  %s215_s3 = inlined_call_operand.hbm [shape: f32[2,8,128], index: 3, kind: output, shape index: {}]  }
   0x1   :  { %9 = vsyncpa [#allocation4], 0  ;;  %s14_s14 = sshll.u32 %s212_s0, 4  ;;  %s169_s15 = smov [#allocation2]   ;;  %s15_s14 = int_to_ptr.hbm [resolvable:$true] %s14_s14 }
   0x2   :  { %s16_s16 = sshll.u32 %s169_s15, 4  ;;  %s170_s17 = smov 128   ;;  %s17_s16 = int_to_ptr.vmem [resolvable:$true] %s16_s16 }
   0x3   :  { %s171_s18 = smov 8  }
   0x4   :  { %22 = dma.hbm_to_vmem [thread:$0]  %s15_s14, 256, %s17_s16, [#allocation3], %s170_s17, %s170_s17, %s171_s18  }
   0x5   :  { %165 = dma.done.wait [#allocation3], 256  }
   0x6   :  { %166 = vsyncadd [#allocation3], 4294967040  ;;  %v172_v0 = vmov 0   ;;  %vm39_vm0 = vcmask 64512   ;;  %v33_v1 = vld [vmem:[#allocation2] sm:$0xff]  ;;  %v66_v2 = vld [vmem:[#allocation2 + $0x8] sm:$0xff] }
   0x7   :  { %116 = vset.pattern.permute.xlu0 %v172_v0  ;;  %v31_v3 = vld [vmem:[%s213_s1] sm:$0xff]  ;;  %58 = vmatpush.msra.mxu0 %v33_v1  ;;  %s173_s22 = smov [#allocation5]   ;;  %s96_s1 = sshll.u32 %s215_s3, 4  ;;  %s97_s1 = int_to_ptr.hbm [resolvable:$true] %s96_s1 }
   0x8   :  { %82 = vmatpush.msra.mxu1 %v66_v2  ;;  %v32_v4 = vld [vmem:[%s214_s2] sm:$0xff]  ;;  %109 = vmatmul.msk.f32.vlgmr.msra.gmra.mxu0 %vm39_vm0, %v31_v3  ;;  %s94_s23 = sshll.u32 %s173_s22, 4  ;;  %s95_s23 = int_to_ptr.vmem [resolvable:$true] %s94_s23 }
   0x9   :  { %110 = vmatmul.msk.f32.vlgmr.msra.gmra.mxu1 %vm39_vm0, %v31_v3  ;;  %36 = vperm.xlu0 %116, %v32_v4  }
  0x7b   :  { %v37_v5 = vpop.permute.xlu0 %36 }
  0x85   :  { %v60_v6 = vpop.f32.mrf.mxu0 }
  0x86   :  { %v84_v7 = vpop.f32.mrf.mxu1  ;;  %v61_v8 = vadd.f32 %v60_v6, %v37_v5 }
  0x87   :  { %v85_v9 = vadd.f32 %v84_v7, %v37_v5 }
  0x88   :  { %v63_v10 = vmax.f32 %v61_v8, 0.0 }
  0x89   :  { %v87_v11 = vmax.f32 %v85_v9, 0.0 }
  0x8a   :  { %64 = vst [vmem:[#allocation5] sm:$0xff] %v63_v10 }
  0x8b   :  { %89 = vst [vmem:[#allocation5 + $0x8] sm:$0xff] %v87_v11 }
  0x8c   :  { %102 = dma.vmem_to_hbm [thread:$0]  %s95_s23, 256, %s97_s1, [#allocation4], %s170_s17, %s170_s17, %s171_s18  }
  0x8d   :  { %167 = dma.done.wait [#allocation4], 256  }
  0x8e   :  { %168 = vsyncadd [#allocation4], 4294967040 }
  0x8f   :  { %107 = vsyncpa [#allocation3], 1 }
  0x90   :  { %108 = vsyncpa [#allocation4], 1 }

</bundles_post_ra>
